<compile_context>
chip_gen: v5e
topology: v5e:2x2
jax: 0.10.0
libtpu: 0.0.40
codegen_flags: <defaults>
</compile_context>

<pallas_src>
import jax
import jax.numpy as jnp
from jax.experimental import pallas as pl
from jax.experimental.pallas import tpu as pltpu

IN_F, HID, OUT_F = 2, 32, 1


def mlp_kernel(x_ref, w1t_ref, b1_ref, w2_ref, b2_ref, o_ref):
    x = x_ref[...]        # [2, TB]   (batch on the 128-lane axis)
    w1t = w1t_ref[...]    # [32, 2]   resident block
    b1 = b1_ref[...]      # [32, 1]   resident block
    w2 = w2_ref[...]      # [32, 1]   resident block
    b2 = b2_ref[0, 0]     # scalar (SMEM)

    # Layer 1: K=2 is MXU-degenerate -> two broadcast FMAs on the VPU.
    #   h[j, b] = w1t[j,0]*x[0,b] + w1t[j,1]*x[1,b] + b1[j]
    # The [32,1] operands are lane-constant; Mosaic hoists their splat vregs and
    # reuses them across every 128-lane strip of the tile (VALU stays the floor).
    h = w1t[:, 0:1] * x[0:1, :] + w1t[:, 1:2] * x[1:2, :] + b1   # [32, TB]
    h = jnp.maximum(h, 0.0)

    # Layer 2: N=1 is MXU-degenerate -> VPU multiply + sublane (XLU) reduce.
    out = jnp.sum(h * w2, axis=0, keepdims=True) + b2            # [1, TB]
    o_ref[...] = out.astype(o_ref.dtype)


def _round_up(x, m):
    return ((x + m - 1) // m) * m


def _pick_tile(B, tb):
    """Lane tile: multiple of 128, <= tb, <= B (standard ragged-last-block path),
    and small enough that the grid has >= 2 steps whenever B >= 256 so v7x's two
    TensorCores both get a full step (one extra step is ~0.35 us — negligible)."""
    full = (B // 128) * 128                 # largest 128-multiple <= B
    half = _round_up((B + 1) // 2, 128)     # ~B/2, rounded up to a lane tile
    return max(128, min(tb, full, half))


def _jnp_reference(x, w1, b1, w2, b2):
    return jnp.maximum(x @ w1 + b1, 0.0) @ w2 + b2


def simple_nn_forward_feature_major(x_fm, w1, b1, w2, b2, *, tb=16384):
    """Preferred entry point: x_fm is feature-major [2, B] (batch on lanes).
    Returns the lane-dense [1, B] result with zero wrapper-side HBM copies."""
    in_f, B = x_fm.shape
    hid = w1.shape[1]
    assert (in_f, hid) == (IN_F, HID)
    assert tb % 128 == 0 and tb >= 128

    if B < 128:
        # Under one lane tile of work: a pallas_call cannot beat XLA fusion here.
        h = jnp.maximum(w1.T @ x_fm + b1.reshape(hid, 1), 0.0)
        return w2.reshape(1, hid) @ h + b2.reshape(1, 1)

    TB = _pick_tile(B, tb)
    grid = (pl.cdiv(B, TB),)   # ragged last block handled by Pallas (lane-local math)

    x_fm = x_fm.astype(jnp.float32)
    w1t = w1.T.astype(jnp.float32)                  # [32, 2]  (64 floats, one-time)
    b1c = b1.reshape(hid, 1).astype(jnp.float32)    # [32, 1]
    w2c = w2.reshape(hid, 1).astype(jnp.float32)    # [32, 1]
    b2s = b2.reshape(1, 1).astype(jnp.float32)      # [1, 1] scalar -> SMEM

    cost = pl.CostEstimate(flops=230 * B, transcendentals=0, bytes_accessed=12 * B)

    out_fm = pl.pallas_call(
        mlp_kernel,
        out_shape=jax.ShapeDtypeStruct((1, B), jnp.float32),
        grid=grid,
        in_specs=[
            pl.BlockSpec((IN_F, TB), lambda i: (0, i)),      # x tile (lane-dense)
            pl.BlockSpec((HID, IN_F), lambda i: (0, 0)),     # W1^T (resident)
            pl.BlockSpec((HID, 1), lambda i: (0, 0)),        # b1
            pl.BlockSpec((HID, 1), lambda i: (0, 0)),        # w2
            pl.BlockSpec(memory_space=pltpu.MemorySpace.SMEM),  # b2 scalar
        ],
        out_specs=pl.BlockSpec((1, TB), lambda i: (0, i)),   # lane-dense output
        compiler_params=pltpu.CompilerParams(
            dimension_semantics=("parallel",),               # megacore-shardable (v7x)
            vmem_limit_bytes=32 * 1024 * 1024,               # headroom even on v7x (64 MiB)
        ),
        cost_estimate=cost,
    )(x_fm, w1t, b1c, w2c, b2s)
    return out_fm


def simple_nn_forward(x, w1, b1, w2, b2, *, tb=16384):
    """PyTorch-layout wrapper: x [B, 2] -> [B, 1]."""
    B = x.shape[0]
    if B < 128:
        return _jnp_reference(x.astype(jnp.float32), w1, b1, w2, b2)
    # x.T is the one remaining small wrapper copy (no pad / zero-fill anymore).
    # TODO(synk): producers with feature-major activations should call
    # simple_nn_forward_feature_major directly and skip this transpose entirely.
    out_fm = simple_nn_forward_feature_major(x.T, w1, b1, w2, b2, tb=tb)
    return out_fm.reshape(B, 1)   # [1,B] -> [B,1]: same row-major order, free reshape


def init_params(key):
    """Deterministic init mimicking PyTorch nn.Linear default
    (U[-1/sqrt(fan_in), 1/sqrt(fan_in)]).  Weights stored [in, out]."""
    k1, k2, k3, k4 = jax.random.split(key, 4)
    bound1 = 1.0 / jnp.sqrt(IN_F)
    bound2 = 1.0 / jnp.sqrt(HID)
    w1 = jax.random.uniform(k1, (IN_F, HID), jnp.float32, -bound1, bound1)
    b1 = jax.random.uniform(k2, (1, HID), jnp.float32, -bound1, bound1)
    w2 = jax.random.uniform(k3, (HID, OUT_F), jnp.float32, -bound2, bound2)
    b2 = jax.random.uniform(k4, (1, OUT_F), jnp.float32, -bound2, bound2)
    return w1, b1, w2, b2


if __name__ == "__main__":
    key = jax.random.PRNGKey(0)
    kx, kp = jax.random.split(key)
    w1, b1, w2, b2 = init_params(kp)

    # B=512: Pallas path, grid of 2 lane tiles.
    # B=300: Pallas path, ragged last block (masked output writeback).
    # B=8  : plain-jnp fallback (under one lane tile).
    for B in (512, 300, 8):
        x = jax.random.normal(jax.random.fold_in(kx, B), (B, IN_F), dtype=jnp.float32)
        out = simple_nn_forward(x, w1, b1, w2, b2)
        jax.block_until_ready(out)
        ref = _jnp_reference(x, w1, b1, w2, b2)
        assert out.shape == (B, 1), (B, out.shape)
        assert jnp.allclose(out, ref, atol=1e-5, rtol=1e-5), f"mismatch at B={B}"

    print("KERNEL_OK")
</pallas_src>

<mosaic_0001>
module attributes {stable_mosaic.version = 11 : i64} {
  func.func @mlp_kernel(%arg0: i32, %arg1: memref<2x256xf32, #tpu.memory_space<vmem>>, %arg2: memref<32x2xf32, #tpu.memory_space<vmem>>, %arg3: memref<32x1xf32, #tpu.memory_space<vmem>>, %arg4: memref<32x1xf32, #tpu.memory_space<vmem>>, %arg5: memref<1x1xf32, #tpu.memory_space<smem>>, %arg6: memref<1x256xf32, #tpu.memory_space<vmem>>) attributes {dimension_semantics = [#tpu.dimension_semantics<parallel>], iteration_bounds = array<i64: 2>, scalar_prefetch = 0 : i64, scratch_operands = 0 : i64, tpu.core_type = #tpu.core_type<tc>, window_params = [{transform_indices = @transform_0, window_bounds = array<i64: 2, 256>}, {pipeline_mode = #tpu.pipeline_mode<synchronous>, transform_indices = @transform_1, window_bounds = array<i64: 32, 2>}, {pipeline_mode = #tpu.pipeline_mode<synchronous>, transform_indices = @transform_2, window_bounds = array<i64: 32, 1>}, {pipeline_mode = #tpu.pipeline_mode<synchronous>, transform_indices = @transform_3, window_bounds = array<i64: 32, 1>}, {transform_indices = @transform_4, window_bounds = array<i64: 1, 1>}, {transform_indices = @transform_5, window_bounds = array<i64: 1, 256>}]} {
    %c0 = arith.constant 0 : index
    %c0_0 = arith.constant 0 : index
    %0 = vector.load %arg1[%c0, %c0_0] : memref<2x256xf32, #tpu.memory_space<vmem>>, vector<2x256xf32>
    %c0_1 = arith.constant 0 : index
    %c0_2 = arith.constant 0 : index
    %1 = vector.load %arg2[%c0_1, %c0_2] : memref<32x2xf32, #tpu.memory_space<vmem>>, vector<32x2xf32>
    %c0_3 = arith.constant 0 : index
    %c0_4 = arith.constant 0 : index
    %2 = vector.load %arg3[%c0_3, %c0_4] : memref<32x1xf32, #tpu.memory_space<vmem>>, vector<32x1xf32>
    %c0_5 = arith.constant 0 : index
    %c0_6 = arith.constant 0 : index
    %3 = vector.load %arg4[%c0_5, %c0_6] : memref<32x1xf32, #tpu.memory_space<vmem>>, vector<32x1xf32>
    %c0_7 = arith.constant 0 : index
    %c0_8 = arith.constant 0 : index
    %4 = memref.load %arg5[%c0_7, %c0_8] : memref<1x1xf32, #tpu.memory_space<smem>>
    %5 = vector.extract_strided_slice %1 {offsets = [0, 0], sizes = [32, 1], strides = [1, 1]} : vector<32x2xf32> to vector<32x1xf32>
    %6 = vector.extract_strided_slice %0 {offsets = [0, 0], sizes = [1, 256], strides = [1, 1]} : vector<2x256xf32> to vector<1x256xf32>
    %7 = vector.broadcast %5 : vector<32x1xf32> to vector<32x256xf32>
    %8 = vector.broadcast %6 : vector<1x256xf32> to vector<32x256xf32>
    %9 = arith.mulf %7, %8 : vector<32x256xf32>
    %10 = vector.extract_strided_slice %1 {offsets = [0, 1], sizes = [32, 1], strides = [1, 1]} : vector<32x2xf32> to vector<32x1xf32>
    %11 = vector.extract_strided_slice %0 {offsets = [1, 0], sizes = [1, 256], strides = [1, 1]} : vector<2x256xf32> to vector<1x256xf32>
    %12 = vector.broadcast %10 : vector<32x1xf32> to vector<32x256xf32>
    %13 = vector.broadcast %11 : vector<1x256xf32> to vector<32x256xf32>
    %14 = arith.mulf %12, %13 : vector<32x256xf32>
    %15 = arith.addf %9, %14 : vector<32x256xf32>
    %16 = vector.broadcast %2 : vector<32x1xf32> to vector<32x256xf32>
    %17 = arith.addf %15, %16 : vector<32x256xf32>
    %cst = arith.constant 0.000000e+00 : f32
    %18 = vector.broadcast %cst : f32 to vector<32x256xf32>
    %19 = arith.maximumf %17, %18 : vector<32x256xf32>
    %20 = vector.broadcast %3 : vector<32x1xf32> to vector<32x256xf32>
    %21 = arith.mulf %19, %20 : vector<32x256xf32>
    %cst_9 = arith.constant dense<0.000000e+00> : vector<256xf32>
    %22 = vector.multi_reduction <add>, %21, %cst_9 [0] : vector<32x256xf32> to vector<256xf32>
    %23 = vector.shape_cast %22 : vector<256xf32> to vector<1x256xf32>
    %24 = vector.broadcast %4 : f32 to vector<1x256xf32>
    %25 = arith.addf %23, %24 : vector<1x256xf32>
    %c0_10 = arith.constant 0 : index
    %c0_11 = arith.constant 0 : index
    %26 = vector.load %arg6[%c0_10, %c0_11] : memref<1x256xf32, #tpu.memory_space<vmem>>, vector<1x256xf32>
    tpu.vector_store %arg6[%c0_10, %c0_11], %25 {strides = array<i32>} : memref<1x256xf32, #tpu.memory_space<vmem>>, vector<1x256xf32>,
    return
  }
  func.func @transform_0(%arg0: i32) -> (i32, i32) {
    %c0_i32 = arith.constant 0 : i32
    %c0_i32_0 = arith.constant 0 : i32
    return %c0_i32, %arg0 : i32, i32
  }
  func.func @transform_1(%arg0: i32) -> (i32, i32) {
    %c0_i32 = arith.constant 0 : i32
    %c0_i32_0 = arith.constant 0 : i32
    %c0_i32_1 = arith.constant 0 : i32
    return %c0_i32, %c0_i32_0 : i32, i32
  }
  func.func @transform_2(%arg0: i32) -> (i32, i32) {
    %c0_i32 = arith.constant 0 : i32
    %c0_i32_0 = arith.constant 0 : i32
    %c0_i32_1 = arith.constant 0 : i32
    return %c0_i32, %c0_i32_0 : i32, i32
  }
  func.func @transform_3(%arg0: i32) -> (i32, i32) {
    %c0_i32 = arith.constant 0 : i32
    %c0_i32_0 = arith.constant 0 : i32
    %c0_i32_1 = arith.constant 0 : i32
    return %c0_i32, %c0_i32_0 : i32, i32
  }
  func.func @transform_4(%arg0: i32) -> (i32, i32) {
    %c0_i32 = arith.constant 0 : i32
    %c0_i32_0 = arith.constant 0 : i32
    %c0_i32_1 = arith.constant 0 : i32
    return %c0_i32, %c0_i32_0 : i32, i32
  }
  func.func @transform_5(%arg0: i32) -> (i32, i32) {
    %c0_i32 = arith.constant 0 : i32
    %c0_i32_0 = arith.constant 0 : i32
    return %c0_i32, %arg0 : i32, i32
  }
}

</mosaic_0001>

<bundles_post_ra>
// kernel: tpu_custom_call.1
= control target key start
LH: loop header
LB: loop body
LE: loop exit
PB: predicated region body
PF: predicated region fallthrough
CT: control target
= control target key end

     0   :  { %s767_s0 = inlined_call_operand.vmem [shape: f32[2,512], index: 0, kind: input, shape index: {}]   ;;  %s768_s1 = inlined_call_operand.vmem [shape: f32[32,2], index: 1, kind: input, shape index: {}]   ;;  %s769_s2 = inlined_call_operand.vmem [shape: f32[32,1], index: 2, kind: input, shape index: {}]   ;;  %s770_s3 = inlined_call_operand.vmem [shape: f32[32,1], index: 3, kind: input, shape index: {}]   ;;  %s771_s4 = inlined_call_operand.<no memory space> [shape: f32[1,1], index: 4, kind: input, shape index: {}]   ;;  %s772_s5 = inlined_call_operand.hbm [shape: f32[1,512], index: 5, kind: output, shape index: {}]  }
   0x1   :  { %10 = sst [smem:[#allocation2]] %s771_s4 }
   0x2   :  { %11 = vsyncpa [#allocation4], 0 }
   0x3   :  { %13 = vsyncpa [#allocation4 + $0x1], 0  ;;  %s643_s20 = smov 0   ;;  %s645_s21 = smov 0  }
   0x4   :  { %s647_s22 = smov 0   ;;  %s649_s23 = smov 0  }
   0x5 LB: > { %s484_s4 = sadd.s32 4294967295, %s606_s23   ;;  %s485_s24 = sadd.s32 4294967294, %s606_s23   ;;  %s606_s23 = sphi %s649_s23, %s778_s23   ;;  %s602_s22 = sphi %s647_s22, %s777_s22   ;;  %s598_s21 = sphi %s645_s21, %s776_s21   ;;  %s594_s20 = sphi %s643_s20, %s775_s20  }
   0x6   : > { %s666_s25 = sadd.s32 1, %s606_s23   ;;  %s136_s26 = sadd.s32 1, %s602_s22 }
   0x7   : > { %s133_s27 = ssub.s32 %s606_s23, %s666_s25  ;;  %p146_p0 = scmp.ne.s32.totalorder %s602_s22, %s598_s21 }
   0x8   : > { %p134_p1 = scmp.eq.s32.totalorder %s133_s27, 0  ;;  %p147_p2 = scmp.eq.s32.totalorder %s484_s4, 1 }
   0x9   : > { %p152_p3 = scmp.ne.s32.totalorder %s598_s21, %s594_s20  ;;  %p153_p4 = scmp.eq.s32.totalorder %s485_s24, 1 }
   0xa   : > { %s678_s28 = scalar_select %p134_p1, %s602_s22, %s136_s26  }
   0xb   : > { %p680_p5 = por %p147_p2, %p146_p0  ;;  %p684_p6 = por %p153_p4, %p152_p3 }
   0xc   : > { %p488_p7 = scmp.ge.s32.totalorder %s606_s23, 1  ;;  %p192_p8 = scmp.lt.s32.totalorder %s606_s23, 3 }
   0xe   : > { %p193_p9 = pnand %p488_p7, %p192_p8 }
   0xf   : > { %s728_s13 = sshll.u32 (!%p193_p9), %s484_s4, 1  ;;  %s240_s4 = sld [smem:[#allocation2]] (!%p193_p9) }
  0x10   : > { %196 = sbr.rel (%p193_p9) target bundleno = 206 (0xce), region = 40  ;;  %p221_p10 = scmp.lt.s32.totalorder (!%p193_p9), %s728_s13, 3 }
  0x11   : > { %s217_s19 = sand.u32 (!%p193_p9), 1, %s598_s21   ;;  %s421_s6 = scalar_lea.hbm (!%p193_p9), %s772_s5, %s728_s13 }
  0x12   : > { %s489_s24 = sshll.u32 (!%p193_p9), %s217_s19, 1  ;;  %s425_s9 = sshll.u32 (!%p193_p9), %s421_s6, 4  ;;  %s426_s9 = int_to_ptr.hbm [resolvable:$true] %s425_s9 }
  0x13   : > { %s219_s7 = scalar_lea.vmem (!%p193_p9), [#allocation3], %s489_s24  ;;  %s411_s10 = scalar_lea.sflag (!%p193_p9), [#allocation4], %s217_s19 }
  0x14   : > { %s423_s8 = sshll.u32 (!%p193_p9), %s219_s7, 4  ;;  %s558_s11 = sshra.s32 (!%p193_p9), %s426_s9, 4  ;;  %s424_s8 = int_to_ptr.vmem [resolvable:$true] %s423_s8  ;;  %s559_s11 = int_to_ptr.hbm [resolvable:$true] %s558_s11 }
  0x15   : > { %v230_v0 = vld [vmem:[%s768_s1 + $0x10] sm:$0xff]  ;;  %v608_v1 = vmov 1   ;;  %v609_v2 = vmov 0   ;;  %v228_v3 = vld [vmem:[%s768_s1] sm:$0xff]  ;;  %v231_v4 = vld [vmem:[%s768_s1 + $0x18] sm:$0xff]  ;;  %s222_s14 = scalar_select %p221_p10, %s728_s13, 3 }
  0x16   : > { %539 = vset.pattern.permute.xlu0 %v608_v1  ;;  %537 = vset.pattern.permute.xlu1 %v609_v2  ;;  %v229_v5 = vld [vmem:[%s768_s1 + $0x8] sm:$0xff]  ;;  %v232_v6 = vld [vmem:[%s769_s2] sm:$0xff]  ;;  %v235_v7 = vld [vmem:[%s769_s2 + $0x18] sm:$0xff]  ;;  %vm402_vm0 = vcmask 1040384   ;;  %s560_s12 = scalar_lea.hbm %s559_s11, 2  ;;  %p565_p0 = scmp.lt.s32.totalorder %s559_s11, %s772_s5 }
  0x17   : > { %285 = vperm.xlu0 %539, %v230_v0   ;;  %253 = vperm.xlu1 %537, %v230_v0   ;;  %v233_v8 = vld [vmem:[%s769_s2 + $0x8] sm:$0xff]  ;;  %v234_v9 = vld [vmem:[%s769_s2 + $0x10] sm:$0xff]  ;;  %v236_v10 = vld [vmem:[%s770_s3] sm:$0xff]  ;;  %s491_s15 = sshll.u32 %s222_s14, 1  ;;  %p561_p11 = scmp.ne.s32.totalorder %s559_s11, %s560_s12 }
  0x18   : > { %538 = vset.pattern.permute.xlu2 %v608_v1  ;;  %v237_v11 = vld [vmem:[%s770_s3 + $0x8] sm:$0xff]  ;;  %v238_v12 = vld [vmem:[%s770_s3 + $0x10] sm:$0xff]  ;;  %v239_v13 = vld [vmem:[%s770_s3 + $0x18] sm:$0xff]  ;;  %s224_s18 = scalar_lea.vmem %s767_s0, %s491_s15  ;;  %s564_s15 = scalar_lea.hbm %s772_s5, 4 }
  0x19   : > { %277 = vperm.xlu2 %538, %v228_v3   ;;  %v227_v21 = vld [vmem:[%s224_s18] sm:$0xf]  ;;  %p562_p12 = pnand %p561_p11, %p680_p5  ;;  %p566_p1 = scmp.lt.s32.totalorder %s564_s15, %s560_s12 }
  0x1a   : > { %v262_v23 = vperm.slane %v227_v21, 0  ;;  %v263_v24 = vperm.slane %v227_v21, 2  ;;  %v292_v25 = vperm.slane %v227_v21, 1  ;;  %v293_v26 = vperm.slane %v227_v21, 3 }
  0x1b   : > { %p563_p13 = pneg %p562_p12  ;;  %p567_p2 = por %p566_p1, %p565_p0 }
  0x1c   : > { %v266_v27 = vperm.slane %v262_v23, 0  ;;  %v267_v28 = vperm.slane %v263_v24, 0  ;;  %v296_v29 = vperm.slane %v292_v25, 1  ;;  %v297_v30 = vperm.slane %v293_v26, 1 }
  0x1d   : > { %p568_p3 = pnand %p567_p2, %p563_p13 }
  0x1f   : > { %540 = vset.pattern.permute.xlu0 %v609_v2  ;;  %258 = vperm.xlu1 %537, %v231_v4  }
  0x20   : > { %243 = vperm.xlu0 %540, %v228_v3  }
  0x21   : > { %281 = vperm.xlu2 %538, %v229_v5  }
  0x27   : > { %541 = vset.pattern.permute.xlu1 %v608_v1 }
  0x28   : > { %289 = vperm.xlu1 %541, %v231_v4   ;;  %248 = vperm.xlu0 %540, %v229_v5  }
  0x29   : > { %542 = vset.pattern.permute.xlu2 %v609_v2 }
  0x2a   : > { %316 = vperm.xlu2 %542, %v232_v6  }
  0x30   : > { %543 = vset.pattern.permute.xlu1 %v609_v2  ;;  %331 = vperm.xlu0 %540, %v235_v7  }
  0x31   : > { %321 = vperm.xlu1 %543, %v233_v8  }
  0x32   : > { %326 = vperm.xlu2 %542, %v234_v9  }
  0x39   : > { %352 = vperm.xlu1 %543, %v236_v10  }
  0x3a   : > { %357 = vperm.xlu2 %542, %v237_v11  }
  0x41   : > { %362 = vperm.xlu1 %543, %v238_v12  }
  0x42   : > { %367 = vperm.xlu2 %542, %v239_v13  }
  0x73   : > { %v278_v14 = vpop.permute.xlu2 %277 }
  0x74   : > { %v298_v35 = vmul.f32 %v296_v29, %v278_v14  ;;  %v299_v36 = vmul.f32 %v297_v30, %v278_v14 }
  0x7b   : > { %v282_v16 = vpop.permute.xlu2 %281 }
  0x7c   : > { %v300_v46 = vmul.f32 %v296_v29, %v282_v16  ;;  %v301_v47 = vmul.f32 %v297_v30, %v282_v16 }
  0x84   : > { %v317_v19 = vpop.permute.xlu2 %316 }
  0x89   : > { %v254_v15 = vpop.permute.xlu1 %253  ;;  %v286_v17 = vpop.permute.xlu0 %285 }
  0x8a   : > { %v302_v38 = vmul.f32 %v296_v29, %v286_v17  ;;  %v303_v39 = vmul.f32 %v297_v30, %v286_v17  ;;  %v272_v42 = vmul.f32 %v266_v27, %v254_v15  ;;  %v273_v43 = vmul.f32 %v267_v28, %v254_v15 }
  0x8c   : > { %v327_v31 = vpop.permute.xlu2 %326  ;;  %v310_v52 = vadd.f32 %v302_v38, %v272_v42  ;;  %v311_v53 = vadd.f32 %v303_v39, %v273_v43  ;;  %v396_v39 = vstv %s240_s4  ;;  %v405_v42 = vlaneseq }
  0x8e   : > { %v338_v1 = vadd.f32 %v327_v31, %v310_v52  ;;  %v339_v2 = vadd.f32 %v327_v31, %v311_v53  ;;  %vm407_vm1 = vcmp.lt.s32.totalorder %v405_v42, 256 }
  0x90   : > { %v346_v11 = vmax.f32 %v338_v1, 0.0  ;;  %v347_v12 = vmax.f32 %v339_v2, 0.0 }
  0x91   : > { %v259_v18 = vpop.permute.xlu1 %258 }
  0x92   : > { %v244_v20 = vpop.permute.xlu0 %243  ;;  %v274_v56 = vmul.f32 %v266_v27, %v259_v18  ;;  %v275_v57 = vmul.f32 %v267_v28, %v259_v18 }
  0x93   : > { %v268_v32 = vmul.f32 %v266_v27, %v244_v20  ;;  %v269_v33 = vmul.f32 %v267_v28, %v244_v20 }
  0x94   : > { %v358_v58 = vpop.permute.xlu2 %357 }
  0x95   : > { %v306_v44 = vadd.f32 %v298_v35, %v268_v32  ;;  %v307_v45 = vadd.f32 %v299_v36, %v269_v33 }
  0x97   : > { %v334_v54 = vadd.f32 %v317_v19, %v306_v44  ;;  %v335_v55 = vadd.f32 %v317_v19, %v307_v45 }
  0x99   : > { %v342_v3 = vmax.f32 %v334_v54, 0.0  ;;  %v343_v4 = vmax.f32 %v335_v55, 0.0 }
  0x9a   : > { %v290_v22 = vpop.permute.xlu1 %289  ;;  %v249_v34 = vpop.permute.xlu0 %248 }
  0x9b   : > { %v270_v40 = vmul.f32 %v266_v27, %v249_v34  ;;  %v271_v41 = vmul.f32 %v267_v28, %v249_v34  ;;  %v304_v48 = vmul.f32 %v296_v29, %v290_v22  ;;  %v305_v49 = vmul.f32 %v297_v30, %v290_v22 }
  0x9c   : > { %v368_v22 = vpop.permute.xlu2 %367 }
  0x9d   : > { %v308_v50 = vadd.f32 %v300_v46, %v270_v40  ;;  %v309_v51 = vadd.f32 %v301_v47, %v271_v41  ;;  %v312_v63 = vadd.f32 %v304_v48, %v274_v56  ;;  %v313_v0 = vadd.f32 %v305_v49, %v275_v57 }
  0xa2   : > { %v332_v61 = vpop.permute.xlu0 %331 }
  0xa3   : > { %v322_v37 = vpop.permute.xlu1 %321  ;;  %v340_v5 = vadd.f32 %v332_v61, %v312_v63  ;;  %v341_v6 = vadd.f32 %v332_v61, %v313_v0 }
  0xa4   : > { %v336_v59 = vadd.f32 %v322_v37, %v308_v50  ;;  %v337_v60 = vadd.f32 %v322_v37, %v309_v51 }
  0xa5   : > { %v348_v13 = vmax.f32 %v340_v5, 0.0  ;;  %v349_v14 = vmax.f32 %v341_v6, 0.0 }
  0xa6   : > { %v344_v7 = vmax.f32 %v336_v59, 0.0  ;;  %v345_v8 = vmax.f32 %v337_v60, 0.0 }
  0xa7   : > { %v376_v23 = vmul.f32 %v368_v22, %v348_v13  ;;  %v377_v24 = vmul.f32 %v368_v22, %v349_v14 }
  0xa8   : > { %v372_v15 = vmul.f32 %v358_v58, %v344_v7  ;;  %v373_v16 = vmul.f32 %v358_v58, %v345_v8 }
  0xab   : > { %v353_v62 = vpop.permute.xlu1 %352 }
  0xac   : > { %v370_v9 = vmul.f32 %v353_v62, %v342_v3  ;;  %v371_v10 = vmul.f32 %v353_v62, %v343_v4 }
  0xae   : > { %v378_v18 = vadd.f32 %v372_v15, %v370_v9  ;;  %v387_v19 = vadd.f32 %v373_v16, %v371_v10 }
  0xb3   : > { %v363_v17 = vpop.permute.xlu1 %362 }
  0xb4   : > { %v374_v20 = vmul.f32 %v363_v17, %v346_v11  ;;  %v375_v21 = vmul.f32 %v363_v17, %v347_v12 }
  0xb6   : > { %v379_v25 = vadd.f32 %v378_v18, %v374_v20  ;;  %v388_v26 = vadd.f32 %v387_v19, %v375_v21 }
  0xb8   : > { %v380_v27 = vadd.f32 %v379_v25, %v376_v23  ;;  %v389_v28 = vadd.f32 %v388_v26, %v377_v24 }
  0xba   : > { %v381_v29 = vrot.slane %v380_v27, 4  ;;  %v390_v30 = vrot.slane %v389_v28, 4 }
  0xbc   : > { %v382_v31 = vadd.f32 %v381_v29, %v380_v27  ;;  %v391_v32 = vadd.f32 %v390_v30, %v389_v28 }
  0xbe   : > { %v383_v33 = vrot.slane %v382_v31, 2  ;;  %v392_v34 = vrot.slane %v391_v32, 2 }
  0xc0   : > { %v384_v35 = vadd.f32 %v383_v33, %v382_v31  ;;  %v393_v36 = vadd.f32 %v392_v34, %v391_v32 }
  0xc2   : > { %v385_v37 = vrot.slane %v384_v35, 1  ;;  %v394_v38 = vrot.slane %v393_v36, 1 }
  0xc4   : > { %v386_v40 = vadd.f32 %v385_v37, %v384_v35  ;;  %v395_v41 = vadd.f32 %v394_v38, %v393_v36 }
  0xc6   : > { %v398_v43 = vadd.f32 %v396_v39, %v395_v41  ;;  %v397_v44 = vadd.f32 %v396_v39, %v386_v40 }
  0xc8   : > { %v401_v45 = vrot.slane %v398_v43, 7 }
  0xca   : > { %v403_v46 = vsel %vm402_vm0, %v397_v44, %v401_v45 }
  0xcb   : > { %409 = vst.msk [vmem:[%s219_s7] sm:$0x3] %vm407_vm1, %v403_v46 }
  0xcc   : > { %571 = shalt.err (!%p568_p3)
}
  0xcd   : > { %496 = dma.vmem_to_hbm [thread:$0]  (%p680_p5), %s424_s8, 32, %s426_s9, %s411_s10  }
  0xce PF: > { %p502_p4 = scmp.ge.s32.totalorder %s606_s23, 2  ;;  %s437_s18 = sand.u32 1, %s594_s20  }
  0xcf   : > { %s438_s4 = scalar_lea.sflag [#allocation4], %s437_s18 }
  0xd0   : > { %p499_p7 = pnand %p502_p4, %p684_p6 }
  0xd2   : > { %p500_p8 = pneg %p499_p7 }
  0xd4   : > { %589 = dma.done.wait (%p500_p8), %s438_s4, 32  }
  0xd5   : > { %591 = vsyncadd (%p500_p8), %s438_s4, 4294967264  ;;  %p16_p9 = scmp.ge.s32.totalorder %s666_s25, 4   ;;  %s775_s20 = smov %s598_s21 }
  0xd6   : > { %s776_s21 = smov %s602_s22  ;;  %s777_s22 = smov %s678_s28 }
  0xd7   : > { %s778_s23 = smov %s666_s25  ;;  %18 = sbr.rel (!%p16_p9) target bundleno = 5 (0x5), region = 75 }
  0xdc   :  { %444 = vsyncpa [#allocation4], 1 }
  0xdd   :  { %446 = vsyncpa [#allocation4 + $0x1], 1 }

</bundles_post_ra>
